<compile_context>
chip_gen: v7x
topology: tpu7x:2x2x1
jax: 0.10.0
libtpu: 0.0.40
codegen_flags: <defaults>
</compile_context>

<pallas_src>
import jax
import jax.numpy as jnp
from jax.experimental import pallas as pl
from jax.experimental.pallas import tpu as pltpu


def _round_up(n, m):
    return ((n + m - 1) // m) * m


def mlp_logsoftmax_kernel(x_ref, w1_ref, b1_ref, w2_ref, b2_ref, out_ref):
    # x_ref : (5, TB) VMEM    w1_ref: (4, 5) SMEM   b1_ref: (4,) SMEM
    # w2_ref: (3, 4) SMEM     b2_ref: (3,)  SMEM    out_ref: (3, TB) VMEM
    # Full-lane input rows, each (1, TB), accumulated in f32.
    rows = [x_ref[k:k + 1, :].astype(jnp.float32) for k in range(5)]

    # fc1 + ReLU: h[j] = relu(sum_k W1[j,k] * x[k] + b1[j])  (unrolled VPU FMAs)
    h = []
    for j in range(4):
        acc = rows[0] * w1_ref[j, 0]
        for k in range(1, 5):
            acc = acc + rows[k] * w1_ref[j, k]
        h.append(jnp.maximum(acc + b1_ref[j], 0.0))

    # fc4: y[j] = sum_k W2[j,k] * h[k] + b2[j]
    y = []
    for j in range(3):
        acc = h[0] * w2_ref[j, 0]
        for k in range(1, 4):
            acc = acc + h[k] * w2_ref[j, k]
        y.append(acc + b2_ref[j])

    # Numerically stable log_softmax over the 3 class rows — purely elementwise
    # across lanes (no cross-lane reduction).
    m = jnp.maximum(jnp.maximum(y[0], y[1]), y[2])
    z0, z1, z2 = y[0] - m, y[1] - m, y[2] - m
    lse = jnp.log(jnp.exp(z0) + jnp.exp(z1) + jnp.exp(z2))
    out_ref[0:1, :] = (z0 - lse).astype(out_ref.dtype)
    out_ref[1:2, :] = (z1 - lse).astype(out_ref.dtype)
    out_ref[2:3, :] = (z2 - lse).astype(out_ref.dtype)


def nural_netwoek_0hl1g(x, w1, b1, w2, b2, *, batch_tile=2048):
    """x: (B, 5). w1: (4, 5), b1: (4,), w2: (3, 4), b2: (3,) in PyTorch
    nn.Linear (out_features, in_features) layout.
    Returns log_softmax(relu(x @ w1.T + b1) @ w2.T + b2, dim=1) as (B, 3) f32."""
    B = x.shape[0]

    # Layout plumbing: put batch on the lane axis; keep x's own dtype (the
    # kernel casts to f32), params as f32 scalars for SMEM.
    xt = jnp.asarray(x).T                      # (5, B)
    w1f = jnp.asarray(w1, jnp.float32)         # (4, 5)
    b1f = jnp.asarray(b1, jnp.float32)         # (4,)
    w2f = jnp.asarray(w2, jnp.float32)         # (3, 4)
    b2f = jnp.asarray(b2, jnp.float32)         # (3,)

    # Lane-dense batch tile (multiple of 128); pad B up to a whole number of
    # tiles. Tile footprint is a few KiB, far under v7x's 64 MiB VMEM.
    if B <= batch_tile:
        tb = _round_up(max(B, 1), 128)
        bp = tb
    else:
        tb = batch_tile
        bp = _round_up(B, tb)
    if bp != B:
        xt = jnp.pad(xt, ((0, 0), (0, bp - B)))

    smem = pl.BlockSpec(memory_space=pltpu.MemorySpace.SMEM)
    out_t = pl.pallas_call(
        mlp_logsoftmax_kernel,
        out_shape=jax.ShapeDtypeStruct((3, bp), jnp.float32),
        grid=(bp // tb,),
        in_specs=[
            pl.BlockSpec((5, tb), lambda i: (0, i)),   # x: streamed per grid step
            smem, smem, smem, smem,                    # params: SMEM-resident
        ],
        out_specs=pl.BlockSpec((3, tb), lambda i: (0, i)),
        compiler_params=pltpu.CompilerParams(
            dimension_semantics=("parallel",)),        # v7x: split across 2 TCs
    )(xt, w1f, b1f, w2f, b2f)

    return out_t[:, :B].T                              # (B, 3)


if __name__ == "__main__":
    key = jax.random.PRNGKey(0)
    kx, k1, k2, k3, k4, kx2 = jax.random.split(key, 6)

    # Deterministic parameter init (PyTorch nn.Linear-style uniform bounds).
    def linear_init(kw, kb, out_f, in_f):
        bound = 1.0 / (in_f ** 0.5)
        w = jax.random.uniform(kw, (out_f, in_f), jnp.float32, -bound, bound)
        b = jax.random.uniform(kb, (out_f,), jnp.float32, -bound, bound)
        return w, b

    w1, b1 = linear_init(k1, k2, 4, 5)   # fc1: Linear(5, 4)
    w2, b2 = linear_init(k3, k4, 3, 4)   # fc4: Linear(4, 3)

    def reference(x):
        h = jnp.maximum(x @ w1.T + b1, 0.0)
        return jax.nn.log_softmax(h @ w2.T + b2, axis=1)

    # Small batch: single grid step, padded lane axis.
    B = 8
    x = jax.random.normal(kx, (B, 5), dtype=jnp.float32)
    out = nural_netwoek_0hl1g(x, w1, b1, w2, b2)
    jax.block_until_ready(out)
    assert out.shape == (B, 3)
    assert jnp.allclose(out, reference(x), atol=1e-5, rtol=1e-5)

    # Larger, non-tile-multiple batch exercising the multi-step grid + padding.
    B2 = 300
    x2 = jax.random.normal(kx2, (B2, 5), dtype=jnp.float32)
    out2 = nural_netwoek_0hl1g(x2, w1, b1, w2, b2, batch_tile=128)
    jax.block_until_ready(out2)
    assert out2.shape == (B2, 3)
    assert jnp.allclose(out2, reference(x2), atol=1e-5, rtol=1e-5)

    print("KERNEL_OK")
</pallas_src>

<mosaic_0001>
module attributes {stable_mosaic.version = 11 : i64} {
  func.func @mlp_logsoftmax_kernel(%arg0: i32, %arg1: memref<5x128xf32, #tpu.memory_space<vmem>>, %arg2: memref<4x5xf32, #tpu.memory_space<smem>>, %arg3: memref<4xf32, #tpu.memory_space<smem>>, %arg4: memref<3x4xf32, #tpu.memory_space<smem>>, %arg5: memref<3xf32, #tpu.memory_space<smem>>, %arg6: memref<3x128xf32, #tpu.memory_space<vmem>>) attributes {dimension_semantics = [#tpu.dimension_semantics<parallel>], iteration_bounds = array<i64: 1>, scalar_prefetch = 0 : i64, scratch_operands = 0 : i64, tpu.core_type = #tpu.core_type<tc>, window_params = [{transform_indices = @transform_0, window_bounds = array<i64: 5, 128>}, {transform_indices = @transform_1, window_bounds = array<i64: 4, 5>}, {transform_indices = @transform_2, window_bounds = array<i64: 4>}, {transform_indices = @transform_3, window_bounds = array<i64: 3, 4>}, {transform_indices = @transform_4, window_bounds = array<i64: 3>}, {transform_indices = @transform_5, window_bounds = array<i64: 3, 128>}]} {
    %c0 = arith.constant 0 : index
    %c0_0 = arith.constant 0 : index
    %0 = vector.load %arg1[%c0, %c0_0] : memref<5x128xf32, #tpu.memory_space<vmem>>, vector<1x128xf32>
    %c1 = arith.constant 1 : index
    %c0_1 = arith.constant 0 : index
    %1 = vector.load %arg1[%c1, %c0_1] : memref<5x128xf32, #tpu.memory_space<vmem>>, vector<1x128xf32>
    %c2 = arith.constant 2 : index
    %c0_2 = arith.constant 0 : index
    %2 = vector.load %arg1[%c2, %c0_2] : memref<5x128xf32, #tpu.memory_space<vmem>>, vector<1x128xf32>
    %c3 = arith.constant 3 : index
    %c0_3 = arith.constant 0 : index
    %3 = vector.load %arg1[%c3, %c0_3] : memref<5x128xf32, #tpu.memory_space<vmem>>, vector<1x128xf32>
    %c4 = arith.constant 4 : index
    %c0_4 = arith.constant 0 : index
    %4 = vector.load %arg1[%c4, %c0_4] : memref<5x128xf32, #tpu.memory_space<vmem>>, vector<1x128xf32>
    %c0_5 = arith.constant 0 : index
    %c0_6 = arith.constant 0 : index
    %5 = memref.load %arg2[%c0_5, %c0_6] : memref<4x5xf32, #tpu.memory_space<smem>>
    %6 = vector.broadcast %5 : f32 to vector<1x128xf32>
    %7 = arith.mulf %0, %6 : vector<1x128xf32>
    %c0_7 = arith.constant 0 : index
    %c1_8 = arith.constant 1 : index
    %8 = memref.load %arg2[%c0_7, %c1_8] : memref<4x5xf32, #tpu.memory_space<smem>>
    %9 = vector.broadcast %8 : f32 to vector<1x128xf32>
    %10 = arith.mulf %1, %9 : vector<1x128xf32>
    %11 = arith.addf %7, %10 : vector<1x128xf32>
    %c0_9 = arith.constant 0 : index
    %c2_10 = arith.constant 2 : index
    %12 = memref.load %arg2[%c0_9, %c2_10] : memref<4x5xf32, #tpu.memory_space<smem>>
    %13 = vector.broadcast %12 : f32 to vector<1x128xf32>
    %14 = arith.mulf %2, %13 : vector<1x128xf32>
    %15 = arith.addf %11, %14 : vector<1x128xf32>
    %c0_11 = arith.constant 0 : index
    %c3_12 = arith.constant 3 : index
    %16 = memref.load %arg2[%c0_11, %c3_12] : memref<4x5xf32, #tpu.memory_space<smem>>
    %17 = vector.broadcast %16 : f32 to vector<1x128xf32>
    %18 = arith.mulf %3, %17 : vector<1x128xf32>
    %19 = arith.addf %15, %18 : vector<1x128xf32>
    %c0_13 = arith.constant 0 : index
    %c4_14 = arith.constant 4 : index
    %20 = memref.load %arg2[%c0_13, %c4_14] : memref<4x5xf32, #tpu.memory_space<smem>>
    %21 = vector.broadcast %20 : f32 to vector<1x128xf32>
    %22 = arith.mulf %4, %21 : vector<1x128xf32>
    %23 = arith.addf %19, %22 : vector<1x128xf32>
    %c0_15 = arith.constant 0 : index
    %24 = memref.load %arg3[%c0_15] : memref<4xf32, #tpu.memory_space<smem>>
    %25 = vector.broadcast %24 : f32 to vector<1x128xf32>
    %26 = arith.addf %23, %25 : vector<1x128xf32>
    %cst = arith.constant 0.000000e+00 : f32
    %27 = vector.broadcast %cst : f32 to vector<1x128xf32>
    %28 = arith.maximumf %26, %27 : vector<1x128xf32>
    %c1_16 = arith.constant 1 : index
    %c0_17 = arith.constant 0 : index
    %29 = memref.load %arg2[%c1_16, %c0_17] : memref<4x5xf32, #tpu.memory_space<smem>>
    %30 = vector.broadcast %29 : f32 to vector<1x128xf32>
    %31 = arith.mulf %0, %30 : vector<1x128xf32>
    %c1_18 = arith.constant 1 : index
    %c1_19 = arith.constant 1 : index
    %32 = memref.load %arg2[%c1_18, %c1_19] : memref<4x5xf32, #tpu.memory_space<smem>>
    %33 = vector.broadcast %32 : f32 to vector<1x128xf32>
    %34 = arith.mulf %1, %33 : vector<1x128xf32>
    %35 = arith.addf %31, %34 : vector<1x128xf32>
    %c1_20 = arith.constant 1 : index
    %c2_21 = arith.constant 2 : index
    %36 = memref.load %arg2[%c1_20, %c2_21] : memref<4x5xf32, #tpu.memory_space<smem>>
    %37 = vector.broadcast %36 : f32 to vector<1x128xf32>
    %38 = arith.mulf %2, %37 : vector<1x128xf32>
    %39 = arith.addf %35, %38 : vector<1x128xf32>
    %c1_22 = arith.constant 1 : index
    %c3_23 = arith.constant 3 : index
    %40 = memref.load %arg2[%c1_22, %c3_23] : memref<4x5xf32, #tpu.memory_space<smem>>
    %41 = vector.broadcast %40 : f32 to vector<1x128xf32>
    %42 = arith.mulf %3, %41 : vector<1x128xf32>
    %43 = arith.addf %39, %42 : vector<1x128xf32>
    %c1_24 = arith.constant 1 : index
    %c4_25 = arith.constant 4 : index
    %44 = memref.load %arg2[%c1_24, %c4_25] : memref<4x5xf32, #tpu.memory_space<smem>>
    %45 = vector.broadcast %44 : f32 to vector<1x128xf32>
    %46 = arith.mulf %4, %45 : vector<1x128xf32>
    %47 = arith.addf %43, %46 : vector<1x128xf32>
    %c1_26 = arith.constant 1 : index
    %48 = memref.load %arg3[%c1_26] : memref<4xf32, #tpu.memory_space<smem>>
    %49 = vector.broadcast %48 : f32 to vector<1x128xf32>
    %50 = arith.addf %47, %49 : vector<1x128xf32>
    %cst_27 = arith.constant 0.000000e+00 : f32
    %51 = vector.broadcast %cst_27 : f32 to vector<1x128xf32>
    %52 = arith.maximumf %50, %51 : vector<1x128xf32>
    %c2_28 = arith.constant 2 : index
    %c0_29 = arith.constant 0 : index
    %53 = memref.load %arg2[%c2_28, %c0_29] : memref<4x5xf32, #tpu.memory_space<smem>>
    %54 = vector.broadcast %53 : f32 to vector<1x128xf32>
    %55 = arith.mulf %0, %54 : vector<1x128xf32>
    %c2_30 = arith.constant 2 : index
    %c1_31 = arith.constant 1 : index
    %56 = memref.load %arg2[%c2_30, %c1_31] : memref<4x5xf32, #tpu.memory_space<smem>>
    %57 = vector.broadcast %56 : f32 to vector<1x128xf32>
    %58 = arith.mulf %1, %57 : vector<1x128xf32>
    %59 = arith.addf %55, %58 : vector<1x128xf32>
    %c2_32 = arith.constant 2 : index
    %c2_33 = arith.constant 2 : index
    %60 = memref.load %arg2[%c2_32, %c2_33] : memref<4x5xf32, #tpu.memory_space<smem>>
    %61 = vector.broadcast %60 : f32 to vector<1x128xf32>
    %62 = arith.mulf %2, %61 : vector<1x128xf32>
    %63 = arith.addf %59, %62 : vector<1x128xf32>
    %c2_34 = arith.constant 2 : index
    %c3_35 = arith.constant 3 : index
    %64 = memref.load %arg2[%c2_34, %c3_35] : memref<4x5xf32, #tpu.memory_space<smem>>
    %65 = vector.broadcast %64 : f32 to vector<1x128xf32>
    %66 = arith.mulf %3, %65 : vector<1x128xf32>
    %67 = arith.addf %63, %66 : vector<1x128xf32>
    %c2_36 = arith.constant 2 : index
    %c4_37 = arith.constant 4 : index
    %68 = memref.load %arg2[%c2_36, %c4_37] : memref<4x5xf32, #tpu.memory_space<smem>>
    %69 = vector.broadcast %68 : f32 to vector<1x128xf32>
    %70 = arith.mulf %4, %69 : vector<1x128xf32>
    %71 = arith.addf %67, %70 : vector<1x128xf32>
    %c2_38 = arith.constant 2 : index
    %72 = memref.load %arg3[%c2_38] : memref<4xf32, #tpu.memory_space<smem>>
    %73 = vector.broadcast %72 : f32 to vector<1x128xf32>
    %74 = arith.addf %71, %73 : vector<1x128xf32>
    %cst_39 = arith.constant 0.000000e+00 : f32
    %75 = vector.broadcast %cst_39 : f32 to vector<1x128xf32>
    %76 = arith.maximumf %74, %75 : vector<1x128xf32>
    %c3_40 = arith.constant 3 : index
    %c0_41 = arith.constant 0 : index
    %77 = memref.load %arg2[%c3_40, %c0_41] : memref<4x5xf32, #tpu.memory_space<smem>>
    %78 = vector.broadcast %77 : f32 to vector<1x128xf32>
    %79 = arith.mulf %0, %78 : vector<1x128xf32>
    %c3_42 = arith.constant 3 : index
    %c1_43 = arith.constant 1 : index
    %80 = memref.load %arg2[%c3_42, %c1_43] : memref<4x5xf32, #tpu.memory_space<smem>>
    %81 = vector.broadcast %80 : f32 to vector<1x128xf32>
    %82 = arith.mulf %1, %81 : vector<1x128xf32>
    %83 = arith.addf %79, %82 : vector<1x128xf32>
    %c3_44 = arith.constant 3 : index
    %c2_45 = arith.constant 2 : index
    %84 = memref.load %arg2[%c3_44, %c2_45] : memref<4x5xf32, #tpu.memory_space<smem>>
    %85 = vector.broadcast %84 : f32 to vector<1x128xf32>
    %86 = arith.mulf %2, %85 : vector<1x128xf32>
    %87 = arith.addf %83, %86 : vector<1x128xf32>
    %c3_46 = arith.constant 3 : index
    %c3_47 = arith.constant 3 : index
    %88 = memref.load %arg2[%c3_46, %c3_47] : memref<4x5xf32, #tpu.memory_space<smem>>
    %89 = vector.broadcast %88 : f32 to vector<1x128xf32>
    %90 = arith.mulf %3, %89 : vector<1x128xf32>
    %91 = arith.addf %87, %90 : vector<1x128xf32>
    %c3_48 = arith.constant 3 : index
    %c4_49 = arith.constant 4 : index
    %92 = memref.load %arg2[%c3_48, %c4_49] : memref<4x5xf32, #tpu.memory_space<smem>>
    %93 = vector.broadcast %92 : f32 to vector<1x128xf32>
    %94 = arith.mulf %4, %93 : vector<1x128xf32>
    %95 = arith.addf %91, %94 : vector<1x128xf32>
    %c3_50 = arith.constant 3 : index
    %96 = memref.load %arg3[%c3_50] : memref<4xf32, #tpu.memory_space<smem>>
    %97 = vector.broadcast %96 : f32 to vector<1x128xf32>
    %98 = arith.addf %95, %97 : vector<1x128xf32>
    %cst_51 = arith.constant 0.000000e+00 : f32
    %99 = vector.broadcast %cst_51 : f32 to vector<1x128xf32>
    %100 = arith.maximumf %98, %99 : vector<1x128xf32>
    %c0_52 = arith.constant 0 : index
    %c0_53 = arith.constant 0 : index
    %101 = memref.load %arg4[%c0_52, %c0_53] : memref<3x4xf32, #tpu.memory_space<smem>>
    %102 = vector.broadcast %101 : f32 to vector<1x128xf32>
    %103 = arith.mulf %28, %102 : vector<1x128xf32>
    %c0_54 = arith.constant 0 : index
    %c1_55 = arith.constant 1 : index
    %104 = memref.load %arg4[%c0_54, %c1_55] : memref<3x4xf32, #tpu.memory_space<smem>>
    %105 = vector.broadcast %104 : f32 to vector<1x128xf32>
    %106 = arith.mulf %52, %105 : vector<1x128xf32>
    %107 = arith.addf %103, %106 : vector<1x128xf32>
    %c0_56 = arith.constant 0 : index
    %c2_57 = arith.constant 2 : index
    %108 = memref.load %arg4[%c0_56, %c2_57] : memref<3x4xf32, #tpu.memory_space<smem>>
    %109 = vector.broadcast %108 : f32 to vector<1x128xf32>
    %110 = arith.mulf %76, %109 : vector<1x128xf32>
    %111 = arith.addf %107, %110 : vector<1x128xf32>
    %c0_58 = arith.constant 0 : index
    %c3_59 = arith.constant 3 : index
    %112 = memref.load %arg4[%c0_58, %c3_59] : memref<3x4xf32, #tpu.memory_space<smem>>
    %113 = vector.broadcast %112 : f32 to vector<1x128xf32>
    %114 = arith.mulf %100, %113 : vector<1x128xf32>
    %115 = arith.addf %111, %114 : vector<1x128xf32>
    %c0_60 = arith.constant 0 : index
    %116 = memref.load %arg5[%c0_60] : memref<3xf32, #tpu.memory_space<smem>>
    %117 = vector.broadcast %116 : f32 to vector<1x128xf32>
    %118 = arith.addf %115, %117 : vector<1x128xf32>
    %c1_61 = arith.constant 1 : index
    %c0_62 = arith.constant 0 : index
    %119 = memref.load %arg4[%c1_61, %c0_62] : memref<3x4xf32, #tpu.memory_space<smem>>
    %120 = vector.broadcast %119 : f32 to vector<1x128xf32>
    %121 = arith.mulf %28, %120 : vector<1x128xf32>
    %c1_63 = arith.constant 1 : index
    %c1_64 = arith.constant 1 : index
    %122 = memref.load %arg4[%c1_63, %c1_64] : memref<3x4xf32, #tpu.memory_space<smem>>
    %123 = vector.broadcast %122 : f32 to vector<1x128xf32>
    %124 = arith.mulf %52, %123 : vector<1x128xf32>
    %125 = arith.addf %121, %124 : vector<1x128xf32>
    %c1_65 = arith.constant 1 : index
    %c2_66 = arith.constant 2 : index
    %126 = memref.load %arg4[%c1_65, %c2_66] : memref<3x4xf32, #tpu.memory_space<smem>>
    %127 = vector.broadcast %126 : f32 to vector<1x128xf32>
    %128 = arith.mulf %76, %127 : vector<1x128xf32>
    %129 = arith.addf %125, %128 : vector<1x128xf32>
    %c1_67 = arith.constant 1 : index
    %c3_68 = arith.constant 3 : index
    %130 = memref.load %arg4[%c1_67, %c3_68] : memref<3x4xf32, #tpu.memory_space<smem>>
    %131 = vector.broadcast %130 : f32 to vector<1x128xf32>
    %132 = arith.mulf %100, %131 : vector<1x128xf32>
    %133 = arith.addf %129, %132 : vector<1x128xf32>
    %c1_69 = arith.constant 1 : index
    %134 = memref.load %arg5[%c1_69] : memref<3xf32, #tpu.memory_space<smem>>
    %135 = vector.broadcast %134 : f32 to vector<1x128xf32>
    %136 = arith.addf %133, %135 : vector<1x128xf32>
    %c2_70 = arith.constant 2 : index
    %c0_71 = arith.constant 0 : index
    %137 = memref.load %arg4[%c2_70, %c0_71] : memref<3x4xf32, #tpu.memory_space<smem>>
    %138 = vector.broadcast %137 : f32 to vector<1x128xf32>
    %139 = arith.mulf %28, %138 : vector<1x128xf32>
    %c2_72 = arith.constant 2 : index
    %c1_73 = arith.constant 1 : index
    %140 = memref.load %arg4[%c2_72, %c1_73] : memref<3x4xf32, #tpu.memory_space<smem>>
    %141 = vector.broadcast %140 : f32 to vector<1x128xf32>
    %142 = arith.mulf %52, %141 : vector<1x128xf32>
    %143 = arith.addf %139, %142 : vector<1x128xf32>
    %c2_74 = arith.constant 2 : index
    %c2_75 = arith.constant 2 : index
    %144 = memref.load %arg4[%c2_74, %c2_75] : memref<3x4xf32, #tpu.memory_space<smem>>
    %145 = vector.broadcast %144 : f32 to vector<1x128xf32>
    %146 = arith.mulf %76, %145 : vector<1x128xf32>
    %147 = arith.addf %143, %146 : vector<1x128xf32>
    %c2_76 = arith.constant 2 : index
    %c3_77 = arith.constant 3 : index
    %148 = memref.load %arg4[%c2_76, %c3_77] : memref<3x4xf32, #tpu.memory_space<smem>>
    %149 = vector.broadcast %148 : f32 to vector<1x128xf32>
    %150 = arith.mulf %100, %149 : vector<1x128xf32>
    %151 = arith.addf %147, %150 : vector<1x128xf32>
    %c2_78 = arith.constant 2 : index
    %152 = memref.load %arg5[%c2_78] : memref<3xf32, #tpu.memory_space<smem>>
    %153 = vector.broadcast %152 : f32 to vector<1x128xf32>
    %154 = arith.addf %151, %153 : vector<1x128xf32>
    %155 = arith.maximumf %118, %136 : vector<1x128xf32>
    %156 = arith.maximumf %155, %154 : vector<1x128xf32>
    %157 = arith.subf %118, %156 : vector<1x128xf32>
    %158 = arith.subf %136, %156 : vector<1x128xf32>
    %159 = arith.subf %154, %156 : vector<1x128xf32>
    %160 = math.exp %157 : vector<1x128xf32>
    %161 = math.exp %158 : vector<1x128xf32>
    %162 = arith.addf %160, %161 : vector<1x128xf32>
    %163 = math.exp %159 : vector<1x128xf32>
    %164 = arith.addf %162, %163 : vector<1x128xf32>
    %165 = math.log %164 : vector<1x128xf32>
    %166 = arith.subf %157, %165 : vector<1x128xf32>
    %c0_79 = arith.constant 0 : index
    %c0_80 = arith.constant 0 : index
    %167 = vector.load %arg6[%c0_79, %c0_80] : memref<3x128xf32, #tpu.memory_space<vmem>>, vector<1x128xf32>
    tpu.vector_store %arg6[%c0_79, %c0_80], %166 {strides = array<i32>} : memref<3x128xf32, #tpu.memory_space<vmem>>, vector<1x128xf32>,
    %168 = arith.subf %158, %165 : vector<1x128xf32>
    %c1_81 = arith.constant 1 : index
    %c0_82 = arith.constant 0 : index
    %169 = vector.load %arg6[%c1_81, %c0_82] : memref<3x128xf32, #tpu.memory_space<vmem>>, vector<1x128xf32>
    tpu.vector_store %arg6[%c1_81, %c0_82], %168 {strides = array<i32>} : memref<3x128xf32, #tpu.memory_space<vmem>>, vector<1x128xf32>,
    %170 = arith.subf %159, %165 : vector<1x128xf32>
    %c2_83 = arith.constant 2 : index
    %c0_84 = arith.constant 0 : index
    %171 = vector.load %arg6[%c2_83, %c0_84] : memref<3x128xf32, #tpu.memory_space<vmem>>, vector<1x128xf32>
    tpu.vector_store %arg6[%c2_83, %c0_84], %170 {strides = array<i32>} : memref<3x128xf32, #tpu.memory_space<vmem>>, vector<1x128xf32>,
    return
  }
  func.func @transform_0(%arg0: i32) -> (i32, i32) {
    %c0_i32 = arith.constant 0 : i32
    %c0_i32_0 = arith.constant 0 : i32
    return %c0_i32, %arg0 : i32, i32
  }
  func.func @transform_1(%arg0: i32) -> (i32, i32) {
    %c0_i32 = arith.constant 0 : i32
    %c0_i32_0 = arith.constant 0 : i32
    %c0_i32_1 = arith.constant 0 : i32
    return %c0_i32, %c0_i32_0 : i32, i32
  }
  func.func @transform_2(%arg0: i32) -> i32 {
    %c0_i32 = arith.constant 0 : i32
    %c0_i32_0 = arith.constant 0 : i32
    return %c0_i32 : i32
  }
  func.func @transform_3(%arg0: i32) -> (i32, i32) {
    %c0_i32 = arith.constant 0 : i32
    %c0_i32_0 = arith.constant 0 : i32
    %c0_i32_1 = arith.constant 0 : i32
    return %c0_i32, %c0_i32_0 : i32, i32
  }
  func.func @transform_4(%arg0: i32) -> i32 {
    %c0_i32 = arith.constant 0 : i32
    %c0_i32_0 = arith.constant 0 : i32
    return %c0_i32 : i32
  }
  func.func @transform_5(%arg0: i32) -> (i32, i32) {
    %c0_i32 = arith.constant 0 : i32
    %c0_i32_0 = arith.constant 0 : i32
    return %c0_i32, %arg0 : i32, i32
  }
}

</mosaic_0001>

<bundles_post_ra>
// kernel: tpu_custom_call.1
= control target key start
LH: loop header
LB: loop body
LE: loop exit
PB: predicated region body
PF: predicated region fallthrough
CT: control target
= control target key end

     0   :  { %10 = vsyncpa [#allocation3], 0  ;;  %s619_s0 = inlined_call_operand.hbm [shape: f32[5,128], index: 0, kind: input, shape index: {}]   ;;  %s620_s1 = inlined_call_operand.hbm [shape: f32[4,5], index: 1, kind: input, shape index: {}]   ;;  %s621_s2 = inlined_call_operand.vmem [shape: f32[4], index: 2, kind: input, shape index: {}]   ;;  %s622_s3 = inlined_call_operand.vmem [shape: f32[3,4], index: 3, kind: input, shape index: {}]   ;;  %s623_s4 = inlined_call_operand.vmem [shape: f32[3], index: 4, kind: input, shape index: {}]   ;;  %s624_s5 = inlined_call_operand.hbm [shape: f32[3,128], index: 5, kind: output, shape index: {}]  }
   0x1   :  { %11 = vsyncpa [#allocation5], 0 }
   0x2   :  { %12 = vsyncpa [#allocation6], 0 }
   0x3   :  { %13 = vsyncpa [#allocation10], 0  ;;  %s49_s20 = sshll.u32 %s622_s3, 4  ;;  %s50_s20 = int_to_ptr.vmem [resolvable:$true] %s49_s20 }
   0x4   :  { %14 = vsyncpa [#allocation4], 0  ;;  %s318_s21 = scalar_lea.vmem %s50_s20, 64  ;;  %p323_p1 = scmp.lt.s32.totalorder %s50_s20, %s50_s20 }
   0x5   :  { %p319_p0 = scmp.ne.s32.totalorder %s50_s20, %s318_s21  ;;  %p324_p2 = scmp.lt.s32.totalorder %s318_s21, %s318_s21 }
   0x7   :  { %p325_p3 = por %p324_p2, %p323_p1 }
   0x9   :  { %p326_p4 = pnand %p325_p3, %p319_p0 }
   0xb   :  { %329 = shalt.err (!%p326_p4)
}
   0xc   :  { %s418_s22 = smov [#allocation9]   ;;  %s419_s23 = smov [#allocation2]  }
   0xd   :  { %52 = dma.vmem_to_smem %s50_s20, 64, %s418_s22, [#allocation10]  }
   0xe   :  { %s21_s24 = sshll.u32 %s419_s23, 4  ;;  %s39_s27 = sshll.u32 %s621_s2, 4  ;;  %s22_s24 = int_to_ptr.vmem [resolvable:$true] %s21_s24  ;;  %s40_s27 = int_to_ptr.vmem [resolvable:$true] %s39_s27 }
   0xf   :  { %s330_s29 = scalar_lea.hbm %s619_s0, 128 }
  0x10   :  { %p331_p5 = scmp.ne.s32.totalorder %s619_s0, %s330_s29  ;;  %p334_p6 = scmp.lt.u32.totalorder %s330_s29, %s619_s0 }
  0x12   :  { %p336_p7 = pnand %p334_p6, %p331_p5 }
  0x14   :  { %339 = shalt.err (!%p336_p7)
}
  0x15   :  { %s340_s9 = scalar_lea.vmem %s22_s24, 128  ;;  %p345_p9 = scmp.lt.s32.totalorder %s22_s24, %s22_s24 }
  0x16   :  { %p341_p8 = scmp.ne.s32.totalorder %s22_s24, %s340_s9  ;;  %p346_p10 = scmp.lt.s32.totalorder %s340_s9, %s340_s9 }
  0x18   :  { %p347_p11 = por %p346_p10, %p345_p9 }
  0x1a   :  { %p348_p12 = pnand %p347_p11, %p341_p8 }
  0x1c   :  { %351 = shalt.err (!%p348_p12)
}
  0x1d   :  { %24 = dma.hbm_to_vmem [thread:$0]  %s619_s0, 128, %s22_s24, [#allocation3]  }
  0x1e   :  { %s352_s13 = scalar_lea.hbm %s620_s1, 64 }
  0x1f   :  { %p353_p13 = scmp.ne.s32.totalorder %s620_s1, %s352_s13  ;;  %p356_p0 = scmp.lt.u32.totalorder %s352_s13, %s620_s1 }
  0x21   :  { %p358_p1 = pnand %p356_p0, %p353_p13 }
  0x23   :  { %361 = shalt.err (!%p358_p1)
}
  0x24   :  { %s420_s18 = smov [#allocation7]   ;;  %s362_s0 = scalar_lea.vmem %s40_s27, 16 }
  0x25   :  { %32 = dma.hbm_to_smem %s620_s1, 64, %s420_s18, [#allocation5]  }
  0x26   :  { %p363_p2 = scmp.ne.s32.totalorder %s40_s27, %s362_s0  ;;  %p367_p3 = scmp.lt.s32.totalorder %s40_s27, %s40_s27 }
  0x27   :  { %p368_p4 = scmp.lt.s32.totalorder %s362_s0, %s362_s0 }
  0x29   :  { %p369_p5 = por %p368_p4, %p367_p3 }
  0x2b   :  { %p370_p6 = pnand %p369_p5, %p363_p2 }
  0x2d   :  { %373 = shalt.err (!%p370_p6)
}
  0x2e   :  { %s421_s21 = smov [#allocation8]   ;;  %s59_s24 = sshll.u32 %s623_s4, 4  ;;  %s60_s24 = int_to_ptr.vmem [resolvable:$true] %s59_s24 }
  0x2f   :  { %42 = dma.vmem_to_smem %s40_s27, 16, %s421_s21, [#allocation6]  }
  0x30   :  { %s374_s25 = scalar_lea.vmem %s60_s24, 16  ;;  %p379_p8 = scmp.lt.s32.totalorder %s60_s24, %s60_s24 }
  0x31   :  { %p375_p7 = scmp.ne.s32.totalorder %s60_s24, %s374_s25  ;;  %p380_p9 = scmp.lt.s32.totalorder %s374_s25, %s374_s25 }
  0x33   :  { %p381_p10 = por %p380_p9, %p379_p8 }
  0x35   :  { %p382_p11 = pnand %p381_p10, %p375_p7 }
  0x37   :  { %385 = shalt.err (!%p382_p11)
}
  0x38   :  { %s422_s1 = smov [#allocation11]  }
  0x39   :  { %62 = dma.vmem_to_smem %s60_s24, 16, %s422_s1, [#allocation10]  }
  0x3a   :  { %408 = dma.done.wait [#allocation3], 128  }
  0x3b   :  { %409 = vsyncadd [#allocation3], 4294967168 }
  0x3c   :  { %410 = dma.done.wait [#allocation5], 64  }
  0x3d   :  { %411 = vsyncadd [#allocation5], 4294967232 }
  0x3e   :  { %412 = dma.done.wait [#allocation6], 16  }
  0x3f   :  { %413 = vsyncadd [#allocation6], 4294967280 }
  0x40   :  { %414 = dma.done.wait [#allocation10], 80  }
  0x41   :  { %415 = vsyncadd [#allocation10], 4294967216 }
  0x42   :  { %78 = sfence }
  0x43   :  { %s84_s4 = sld [smem:[#allocation7]]  ;;  %s269_s26 = sld [smem:[#allocation7 + $0x1]]  ;;  %v487_v0 = vld [vmem:[#allocation2] sm:$0x1]  ;;  %v489_v1 = vld [vmem:[#allocation2 + $0x1] sm:$0x1] }
  0x44   :  { %s270_s27 = sld [smem:[#allocation7 + $0x2]]  ;;  %s271_s28 = sld [smem:[#allocation7 + $0x3]]  ;;  %v493_v2 = vld [vmem:[#allocation2 + $0x2] sm:$0x1]  ;;  %v495_v3 = vld [vmem:[#allocation2 + $0x3] sm:$0x1] }
  0x45   :  { %s272_s3 = sld [smem:[#allocation7 + $0x4]]  ;;  %s491_s29 = sld [smem:[#allocation8]]  ;;  %v501_v4 = vld [vmem:[#allocation2 + $0x4] sm:$0x1] }
  0x46   :  { %s273_s30 = sld [smem:[#allocation7 + $0x80]]  ;;  %s274_s6 = sld [smem:[#allocation7 + $0x81]] }
  0x47   :  { %s275_s7 = sld [smem:[#allocation7 + $0x82]]  ;;  %s497_s8 = sld [smem:[#allocation7 + $0x83]] }
  0x48   :  { %s499_s9 = sld [smem:[#allocation7 + $0x84]]  ;;  %s503_s2 = sld [smem:[#allocation8 + $0x1]] }
  0x49   :  { %v85_v5 = vstv %s84_s4  ;;  %s505_s10 = sld [smem:[#allocation7 + $0x100]]  ;;  %v88_v7 = vstv %s269_s26  ;;  %s508_s11 = sld [smem:[#allocation7 + $0x101]] }
  0x4a   :  { %v86_v6 = vmul.f32 %v85_v5, %v487_v0  ;;  %v92_v8 = vstv %s270_s27  ;;  %s510_s12 = sld [smem:[#allocation7 + $0x102]]  ;;  %v89_v9 = vmul.f32 %v88_v7, %v489_v1  ;;  %v96_v11 = vstv %s271_s28  ;;  %s514_s13 = sld [smem:[#allocation7 + $0x103]] }
  0x4b   :  { %v93_v10 = vmul.f32 %v92_v8, %v493_v2  ;;  %v100_v12 = vstv %s272_s3  ;;  %s516_s14 = sld [smem:[#allocation7 + $0x104]]  ;;  %v97_v13 = vmul.f32 %v96_v11, %v495_v3  ;;  %s520_s15 = sld [smem:[#allocation7 + $0x180]]  ;;  %v104_v25 = vstv %s491_s29 }
  0x4c   :  { %v101_v14 = vmul.f32 %v100_v12, %v501_v4  ;;  %v108_v15 = vstv %s273_s30  ;;  %v90_v16 = vadd.f32 %v89_v9, %v86_v6  ;;  %v111_v18 = vstv %s274_s6  ;;  %s523_s16 = sld [smem:[#allocation7 + $0x181]]  ;;  %s525_s17 = sld [smem:[#allocation7 + $0x182]] }
  0x4d   :  { %v109_v17 = vmul.f32 %v108_v15, %v487_v0  ;;  %v115_v19 = vstv %s275_s7  ;;  %v112_v20 = vmul.f32 %v111_v18, %v489_v1  ;;  %v119_v22 = vstv %s497_s8  ;;  %s531_s18 = sld [smem:[#allocation7 + $0x183]]  ;;  %s533_s19 = sld [smem:[#allocation7 + $0x184]] }
  0x4e   :  { %v116_v21 = vmul.f32 %v115_v19, %v493_v2  ;;  %v123_v23 = vstv %s499_s9  ;;  %v94_v24 = vadd.f32 %v93_v10, %v90_v16  ;;  %v120_v26 = vmul.f32 %v119_v22, %v495_v3  ;;  %s541_s20 = sld [smem:[#allocation8 + $0x2]]  ;;  %s543_s0 = sld [smem:[#allocation9]] }
  0x4f   :  { %v124_v27 = vmul.f32 %v123_v23, %v501_v4  ;;  %v113_v28 = vadd.f32 %v112_v20, %v109_v17  ;;  %v131_v29 = vstv %s505_s10  ;;  %v134_v30 = vstv %s508_s11  ;;  %s548_s21 = sld [smem:[#allocation9 + $0x1]]  ;;  %s553_s22 = sld [smem:[#allocation8 + $0x3]] }
  0x50   :  { %v138_v31 = vstv %s510_s12  ;;  %v98_v32 = vadd.f32 %v97_v13, %v94_v24  ;;  %v132_v33 = vmul.f32 %v131_v29, %v487_v0  ;;  %v135_v34 = vmul.f32 %v134_v30, %v489_v1  ;;  %s555_s23 = sld [smem:[#allocation9 + $0x2]]  ;;  %s559_s24 = sld [smem:[#allocation9 + $0x80]] }
  0x51   :  { %v139_v35 = vmul.f32 %v138_v31, %v493_v2  ;;  %v117_v36 = vadd.f32 %v116_v21, %v113_v28  ;;  %v127_v37 = vstv %s503_s2  ;;  %v142_v38 = vstv %s514_s13  ;;  %s561_s25 = sld [smem:[#allocation9 + $0x81]]  ;;  %s566_s1 = sld [smem:[#allocation9 + $0x82]] }
  0x52   :  { %v146_v39 = vstv %s516_s14  ;;  %v102_v40 = vadd.f32 %v101_v14, %v98_v32  ;;  %v136_v41 = vadd.f32 %v135_v34, %v132_v33  ;;  %v143_v42 = vmul.f32 %v142_v38, %v495_v3  ;;  %s570_s4 = sld [smem:[#allocation9 + $0x3]]  ;;  %s575_s26 = sld [smem:[#allocation9 + $0x100]] }
  0x53   :  { %v147_v43 = vmul.f32 %v146_v39, %v501_v4  ;;  %v121_v44 = vadd.f32 %v120_v26, %v117_v36  ;;  %v154_v45 = vstv %s520_s15  ;;  %v157_v46 = vstv %s523_s16  ;;  %s577_s27 = sld [smem:[#allocation9 + $0x101]]  ;;  %s580_s28 = sld [smem:[#allocation9 + $0x83]] }
  0x54   :  { %v161_v47 = vstv %s525_s17  ;;  %v105_v48 = vadd.f32 %v104_v25, %v102_v40  ;;  %v140_v49 = vadd.f32 %v139_v35, %v136_v41  ;;  %v155_v50 = vmul.f32 %v154_v45, %v487_v0  ;;  %s584_s3 = sld [smem:[#allocation9 + $0x102]]  ;;  %s586_s29 = sld [smem:[#allocation9 + $0x103]] }
  0x55   :  { %v158_v51 = vmul.f32 %v157_v46, %v489_v1  ;;  %v125_v52 = vadd.f32 %v124_v27, %v121_v44  ;;  %v162_v53 = vmul.f32 %v161_v47, %v493_v2  ;;  %v165_v54 = vstv %s531_s18  ;;  %s594_s30 = sld [smem:[#allocation11]]  ;;  %s597_s6 = sld [smem:[#allocation11 + $0x1]] }
  0x56   :  { %v169_v55 = vstv %s533_s19  ;;  %v106_v56 = vmax.f32 %v105_v48, 0.0  ;;  %v144_v57 = vadd.f32 %v143_v42, %v140_v49  ;;  %v166_v59 = vmul.f32 %v165_v54, %v495_v3  ;;  %s303_s7 = sld [smem:[#allocation11 + $0x2]]  ;;  %s423_s8 = smov [#allocation12]  }
  0x57   :  { %v159_v58 = vadd.f32 %v158_v51, %v155_v50  ;;  %v128_v60 = vadd.f32 %v127_v37, %v125_v52  ;;  %v150_v61 = vstv %s541_s20  ;;  %v177_v62 = vstv %s543_s0  ;;  %s257_s9 = sshll.u32 %s423_s8, 4  ;;  %s258_s9 = int_to_ptr.vmem [resolvable:$true] %s257_s9 }
  0x58   :  { %v148_v63 = vadd.f32 %v147_v43, %v144_v57  ;;  %v170_v1 = vmul.f32 %v169_v55, %v501_v4  ;;  %v180_v2 = vstv %s548_s21  ;;  %v173_v3 = vstv %s553_s22  ;;  %s386_s2 = scalar_lea.vmem %s258_s9, 64  ;;  %p391_p13 = scmp.lt.s32.totalorder %s258_s9, %s258_s9 }
  0x59   :  { %v163_v0 = vadd.f32 %v162_v53, %v159_v58  ;;  %v129_v5 = vmax.f32 %v128_v60, 0.0  ;;  %v178_v6 = vmul.f32 %v177_v62, %v106_v56  ;;  %v184_v7 = vstv %s555_s23  ;;  %p387_p12 = scmp.ne.s32.totalorder %s258_s9, %s386_s2  ;;  %p392_p0 = scmp.lt.s32.totalorder %s386_s2, %s386_s2 }
  0x5a   :  { %v151_v8 = vadd.f32 %v150_v61, %v148_v63  ;;  %v195_v10 = vstv %s559_s24  ;;  %v198_v11 = vstv %s561_s25  ;;  %v202_v15 = vstv %s566_s1 }
  0x5b   :  { %v167_v9 = vadd.f32 %v166_v59, %v163_v0  ;;  %v181_v12 = vmul.f32 %v180_v2, %v129_v5  ;;  %v196_v13 = vmul.f32 %v195_v10, %v106_v56  ;;  %v199_v14 = vmul.f32 %v198_v11, %v129_v5  ;;  %p393_p1 = por %p392_p0, %p391_p13 }
  0x5c   :  { %v152_v4 = vmax.f32 %v151_v8, 0.0  ;;  %v188_v17 = vstv %s570_s4  ;;  %v213_v20 = vstv %s575_s26  ;;  %v216_v21 = vstv %s577_s27 }
  0x5d   :  { %v171_v16 = vadd.f32 %v170_v1, %v167_v9  ;;  %v182_v18 = vadd.f32 %v181_v12, %v178_v6  ;;  %v200_v19 = vadd.f32 %v199_v14, %v196_v13  ;;  %v214_v25 = vmul.f32 %v213_v20, %v106_v56  ;;  %p394_p2 = pnand %p393_p1, %p387_p12 }
  0x5e   :  { %v185_v23 = vmul.f32 %v184_v7, %v152_v4  ;;  %v203_v24 = vmul.f32 %v202_v15, %v152_v4  ;;  %v206_v26 = vstv %s580_s28  ;;  %v217_v27 = vmul.f32 %v216_v21, %v129_v5 }
  0x5f   :  { %v174_v22 = vadd.f32 %v173_v3, %v171_v16  ;;  %v220_v28 = vstv %s584_s3  ;;  %v224_v29 = vstv %s586_s29  ;;  %v192_v38 = vstv %s594_s30 }
  0x60   :  { %v186_v31 = vadd.f32 %v185_v23, %v182_v18  ;;  %v204_v32 = vadd.f32 %v203_v24, %v200_v19  ;;  %v221_v33 = vmul.f32 %v220_v28, %v152_v4  ;;  %v218_v34 = vadd.f32 %v217_v27, %v214_v25 }
  0x61   :  { %v175_v30 = vmax.f32 %v174_v22, 0.0  ;;  %v210_v39 = vstv %s597_s6  ;;  %v228_v43 = vstv %s303_s7 }
  0x62   :  { %v222_v40 = vadd.f32 %v221_v33, %v218_v34 }
  0x63   :  { %v189_v35 = vmul.f32 %v188_v17, %v175_v30  ;;  %v207_v36 = vmul.f32 %v206_v26, %v175_v30  ;;  %v225_v37 = vmul.f32 %v224_v29, %v175_v30 }
  0x65   :  { %v190_v41 = vadd.f32 %v189_v35, %v186_v31  ;;  %v208_v42 = vadd.f32 %v207_v36, %v204_v32  ;;  %v226_v44 = vadd.f32 %v225_v37, %v222_v40 }
  0x67   :  { %v193_v45 = vadd.f32 %v192_v38, %v190_v41  ;;  %v211_v46 = vadd.f32 %v210_v39, %v208_v42  ;;  %v229_v47 = vadd.f32 %v228_v43, %v226_v44 }
  0x69   :  { %v230_v48 = vmax.f32 %v193_v45, %v211_v46 }
  0x6b   :  { %v231_v49 = vmax.f32 %v230_v48, %v229_v47 }
  0x6d   :  { %v232_v50 = vsub.f32 %v193_v45, %v231_v49  ;;  %v233_v51 = vsub.f32 %v211_v46, %v231_v49  ;;  %v234_v52 = vsub.f32 %v229_v47, %v231_v49 }
  0x6f   :  { %v235_v53 = vmul.f32 1.442695, %v232_v50  ;;  %v237_v54 = vmul.f32 1.442695, %v233_v51  ;;  %v240_v55 = vmul.f32 1.442695, %v234_v52 }
  0x71   :  { %310 = vpow2.f32 %v235_v53 }
  0x72   :  { %312 = vpow2.f32 %v237_v54 }
  0x73   :  { %314 = vpow2.f32 %v240_v55 }
  0x7b   :  { %v311_v56 = vpop.eup %310 }
  0x7c   :  { %v313_v57 = vpop.eup %312 }
  0x7d   :  { %v315_v58 = vpop.eup %314  ;;  %v239_v59 = vadd.f32 %v313_v57, %v311_v56 }
  0x7f   :  { %v242_v60 = vadd.f32 %v315_v58, %v239_v59 }
  0x81   :  { %316 = vlog2.f32 %v242_v60 }
  0x8b   :  { %v317_v61 = vpop.eup %316 }
  0x8c   :  { %v244_v62 = vmul.f32 0.6931472, %v317_v61 }
  0x8e   :  { %v245_v63 = vsub.f32 %v232_v50, %v244_v62  ;;  %v247_v0 = vsub.f32 %v233_v51, %v244_v62  ;;  %v249_v1 = vsub.f32 %v234_v52, %v244_v62 }
  0x90   :  { %246 = vst [vmem:[#allocation12] sm:$0x1] %v245_v63  ;;  %248 = vst [vmem:[#allocation12 + $0x1] sm:$0x1] %v247_v0 }
  0x91   :  { %250 = vst [vmem:[#allocation12 + $0x2] sm:$0x1] %v249_v1 }
  0x92   :  { %397 = shalt.err (!%p394_p2)
}
  0x93   :  { %s398_s12 = scalar_lea.hbm %s624_s5, 64 }
  0x94   :  { %p399_p3 = scmp.ne.s32.totalorder %s624_s5, %s398_s12  ;;  %p402_p4 = scmp.lt.u32.totalorder %s398_s12, %s624_s5 }
  0x96   :  { %p404_p5 = pnand %p402_p4, %p399_p3 }
  0x98   :  { %407 = shalt.err (!%p404_p5)
}
  0x99   :  { %260 = dma.vmem_to_hbm [thread:$0]  %s258_s9, 64, %s624_s5, [#allocation4]  }
  0x9a   :  { %416 = dma.done.wait [#allocation4], 64  }
  0x9b   :  { %417 = vsyncadd [#allocation4], 4294967232 }
  0x9c   :  { %264 = vsyncpa [#allocation3], 1 }
  0x9d   :  { %265 = vsyncpa [#allocation4], 1 }
  0x9e   :  { %266 = vsyncpa [#allocation5], 1 }
  0x9f   :  { %267 = vsyncpa [#allocation6], 1 }
  0xa0   :  { %268 = vsyncpa [#allocation10], 1 }

</bundles_post_ra>
